<compile_context>
chip_gen: v7x
topology: tpu7x:2x2x1
jax: 0.10.0
libtpu: 0.0.40
codegen_flags: <defaults>
</compile_context>

<pallas_src>
import math

import jax
import jax.numpy as jnp
from jax.experimental import pallas as pl
from jax.experimental.pallas import tpu as pltpu

_EPS = 1e-12   # torch.nn.CosineSimilarity eps (per-norm clamp, matches reference)


def _accumulate_tile(x, mvals, wcat, q_acc):
    """Accumulate sigma / P contributions of one (Bt, St, H) tile of X.

    x     : (Bt, St, H) value, native dtype
    mvals : (Bt, St) mask values (same dtype family as x) or None (== ones)
    wcat  : (H, 2R) fused weights [lf1 | lf1 @ lf2 lf2^T]
    q_acc : VMEM ref (Bt, R+1, H) float32; column 0 = sigma, columns 1.. = P
    """
    f32 = jnp.float32
    Bt, St, H = x.shape
    R = wcat.shape[1] // 2

    x2d = x.reshape(Bt * St, H)
    # One MXU pass gives both t = X@lf1 and tG = X@lf1@(lf2 lf2^T).
    ttg = jnp.dot(x2d, wcat.astype(x.dtype), preferred_element_type=f32)  # (Bt*St, 2R)
    t = ttg[:, :R]
    tg = ttg[:, R:]
    # ||lp||^2 = t (lf2 lf2^T) t^T = t . tG  (lp = X@lf1@lf2 never materialised)
    lp_sq = jnp.sum(t * tg, axis=-1, keepdims=True)                       # (Bt*St, 1)
    inv_lpn = jax.lax.rsqrt(jnp.maximum(lp_sq, f32(_EPS * _EPS)))         # EUP rsqrt

    if mvals is None:
        col0 = jnp.ones((Bt * St, 1), f32)
        w = t * inv_lpn
    else:
        m2d = mvals.reshape(Bt * St, 1).astype(f32)
        col0 = m2d
        w = t * (m2d * inv_lpn)
    wfull = jnp.concatenate([col0, w], axis=-1).astype(x.dtype)           # (Bt*St, R+1)

    # Q[b] += wfull[b]^T @ x[b]  — per-batch transposed-LHS 2D matmul on the MXU.
    for b in range(Bt):
        rows = slice(b * St, (b + 1) * St)
        q_acc[b] = q_acc[b] + jax.lax.dot_general(
            wfull[rows], x2d[rows],
            dimension_numbers=(((0,), (0,)), ((), ())),
            preferred_element_type=f32)


def _finalize(gf1, gf2, lf2, q_acc, out_ref):
    f32 = jnp.float32
    qa = q_acc[...]                                                       # (Bt, R+1, H)
    sigma = qa[:, 0, :]                                                   # (Bt, H)
    P = qa[:, 1:, :]                                                      # (Bt, R, H)
    gp = jnp.dot(jnp.dot(sigma, gf1.astype(f32), preferred_element_type=f32),
                 gf2.astype(f32), preferred_element_type=f32)             # (Bt, H)
    u = jnp.einsum("bh,rh->br", gp, lf2.astype(f32),
                   preferred_element_type=f32)                            # (Bt, R)
    gp_sq = jnp.sum(gp * gp, axis=-1, keepdims=True)                      # (Bt, 1)
    inv_gpn = jax.lax.rsqrt(jnp.maximum(gp_sq, f32(_EPS * _EPS)))
    pooled = jnp.sum(P * u[:, :, None], axis=1) * inv_gpn                 # (Bt, H)
    out_ref[...] = pooled.astype(out_ref.dtype)


def _gap_kernel_masked(x_ref, m_ref, gf1_ref, gf2_ref, lf2_ref, wcat_ref,
                       out_ref, q_acc):
    k = pl.program_id(1)

    @pl.when(k == 0)
    def _():
        q_acc[...] = jnp.zeros_like(q_acc)

    _accumulate_tile(x_ref[...], m_ref[...], wcat_ref[...], q_acc)

    @pl.when(k == pl.num_programs(1) - 1)
    def _():
        _finalize(gf1_ref[...], gf2_ref[...], lf2_ref[...], q_acc, out_ref)


def _gap_kernel_nomask(x_ref, gf1_ref, gf2_ref, lf2_ref, wcat_ref,
                       out_ref, q_acc):
    k = pl.program_id(1)

    @pl.when(k == 0)
    def _():
        q_acc[...] = jnp.zeros_like(q_acc)

    _accumulate_tile(x_ref[...], None, wcat_ref[...], q_acc)

    @pl.when(k == pl.num_programs(1) - 1)
    def _():
        _finalize(gf1_ref[...], gf2_ref[...], lf2_ref[...], q_acc, out_ref)


def global_attention_pooling_head(X, gf1, gf2, lf1, lf2, attention_mask=None,
                                  *, block_batch=8, seq_tile_bytes=2 << 20):
    """Pallas implementation of GlobalAttentionPoolingHead.forward."""
    B, S, H = X.shape
    R = gf1.shape[1]
    dtype = X.dtype
    elt = jnp.dtype(dtype).itemsize
    f32 = jnp.float32

    # Fused local-projection weights (small, computed once outside the kernel).
    G = jnp.dot(lf2.astype(f32), lf2.astype(f32).T)                       # (R, R)
    wcat = jnp.concatenate([lf1.astype(f32), jnp.dot(lf1.astype(f32), G)],
                           axis=1)                                        # (H, 2R)

    # ---- batch tiling ----------------------------------------------------
    if B <= block_batch:
        Bt, Bp = B, B
    else:
        Bt = block_batch
        assert Bt % 8 == 0, "block_batch must be a multiple of 8 when B > block_batch"
        Bp = ((B + Bt - 1) // Bt) * Bt

    # ---- sequence tiling (single HBM pass over X; St multiple of 128) -----
    st = max(128, (seq_tile_bytes // max(1, Bt * H * elt)) // 128 * 128)
    if st >= S:
        St, Sp = S, S
    else:
        St = int(st)
        Sp = ((S + St - 1) // St) * St

    if Bp != B or Sp != S:   # zero padding is exact: padded rows contribute 0
        X = jnp.pad(X, ((0, Bp - B), (0, Sp - S), (0, 0)))

    grid = (Bp // Bt, Sp // St)

    x_spec = pl.BlockSpec((Bt, St, H), lambda b, k: (b, k, 0))
    w_specs = [pl.BlockSpec((H, R), lambda b, k: (0, 0)),        # gf1
               pl.BlockSpec((R, H), lambda b, k: (0, 0)),        # gf2
               pl.BlockSpec((R, H), lambda b, k: (0, 0)),        # lf2
               pl.BlockSpec((H, 2 * R), lambda b, k: (0, 0))]    # wcat
    out_spec = pl.BlockSpec((Bt, H), lambda b, k: (b, 0))
    scratch = [pltpu.VMEM((Bt, R + 1, H), jnp.float32)]

    # ---- per-chip VMEM budget with lane-padding-aware accounting ----------
    lane = 128
    try:
        cap = int(pltpu.get_tpu_info().vmem_capacity_bytes)
    except Exception:
        cap = 128 << 20
    budget = min(max(cap // 2, 16 << 20), 64 << 20)
    need = (2 * Bt * St * max(H, lane) * elt                 # X blocks (double-buffered)
            + 2 * Bt * max(St, lane) * elt                   # mask blocks
            + 2 * Bt * max(H, lane) * elt                    # output blocks
            + 2 * 6 * max(H, lane) * max(R, 8) * 4           # factor matrices
            + Bt * (((R + 1) + 7) // 8 * 8) * max(H, lane) * 4   # q_acc scratch
            + 6 * Bt * St * lane * 4                         # lane-padded intermediates
            + (2 << 20))                                     # headroom
    cparams = pltpu.CompilerParams(
        dimension_semantics=("parallel", "arbitrary"),
        vmem_limit_bytes=int(min(max(need, 8 << 20), budget)))

    if attention_mask is None:
        out = pl.pallas_call(
            _gap_kernel_nomask,
            out_shape=jax.ShapeDtypeStruct((Bp, H), dtype),
            grid_spec=pltpu.PrefetchScalarGridSpec(
                num_scalar_prefetch=0, grid=grid,
                in_specs=[x_spec] + w_specs,
                out_specs=out_spec,
                scratch_shapes=scratch),
            compiler_params=cparams,
        )(X, gf1, gf2, lf2, wcat)
    else:
        mask = attention_mask.astype(dtype)                  # lane-dense (B, S)
        if Bp != B or Sp != S:
            mask = jnp.pad(mask, ((0, Bp - B), (0, Sp - S)))
        m_spec = pl.BlockSpec((Bt, St), lambda b, k: (b, k))
        out = pl.pallas_call(
            _gap_kernel_masked,
            out_shape=jax.ShapeDtypeStruct((Bp, H), dtype),
            grid_spec=pltpu.PrefetchScalarGridSpec(
                num_scalar_prefetch=0, grid=grid,
                in_specs=[x_spec, m_spec] + w_specs,
                out_specs=out_spec,
                scratch_shapes=scratch),
            compiler_params=cparams,
        )(X, mask, gf1, gf2, lf2, wcat)

    return out[:B]                                           # (B, H)


def _reference(X, gf1, gf2, lf1, lf2, attention_mask=None):
    """Pure-JAX transcription of the PyTorch forward (per-norm eps clamping)."""
    if attention_mask is None:
        Xa = X
    else:
        Xa = X * attention_mask[:, :, None].astype(X.dtype)
    sigma = jnp.sum(Xa, axis=1, keepdims=True)
    gp = sigma @ gf1 @ gf2
    lp = Xa @ lf1 @ lf2
    num = jnp.sum(lp * gp, axis=2)
    lp_n = jnp.maximum(jnp.linalg.norm(lp, axis=2), 1e-12)
    gp_n = jnp.maximum(jnp.linalg.norm(gp, axis=2), 1e-12)
    attention = num / (lp_n * gp_n)
    return jnp.einsum("ij,ijk->ik", attention, Xa)


if __name__ == "__main__":
    S, H = 8, 32                       # seq, hidden
    R = int(math.ceil(math.sqrt(H)))   # factorization rank

    key = jax.random.PRNGKey(0)
    kg1, kg2, kl1, kl2, kx1, km1, kx2, km2 = jax.random.split(key, 8)

    # torch.rand-style uniform[0,1) parameter init (deterministic)
    gf1 = jax.random.uniform(kg1, (H, R), dtype=jnp.float32)
    gf2 = jax.random.uniform(kg2, (R, H), dtype=jnp.float32)
    lf1 = jax.random.uniform(kl1, (H, R), dtype=jnp.float32)
    lf2 = jax.random.uniform(kl2, (R, H), dtype=jnp.float32)

    ok = True
    for kx, km, B in ((kx1, km1, 2), (kx2, km2, 11)):   # small batch + padded batch
        X = jax.random.normal(kx, (B, S, H), dtype=jnp.float32)
        attention_mask = (jax.random.uniform(km, (B, S)) > 0.25).astype(jnp.float32)

        out_none = global_attention_pooling_head(X, gf1, gf2, lf1, lf2, None)
        out_mask = global_attention_pooling_head(X, gf1, gf2, lf1, lf2, attention_mask)
        jax.block_until_ready((out_none, out_mask))

        ref_none = _reference(X, gf1, gf2, lf1, lf2, None)
        ref_mask = _reference(X, gf1, gf2, lf1, lf2, attention_mask)

        ok &= out_none.shape == (B, H) and out_mask.shape == (B, H)
        ok &= bool(jnp.allclose(out_none, ref_none, rtol=1e-4, atol=1e-4))
        ok &= bool(jnp.allclose(out_mask, ref_mask, rtol=1e-4, atol=1e-4))

    assert ok
    print("KERNEL_OK")
</pallas_src>

<mosaic_0001>
module attributes {stable_mosaic.version = 11 : i64} {
  func.func @_gap_kernel_nomask(%arg0: i32, %arg1: i32, %arg2: memref<2x8x32xf32, #tpu.memory_space<vmem>>, %arg3: memref<32x6xf32, #tpu.memory_space<vmem>>, %arg4: memref<6x32xf32, #tpu.memory_space<vmem>>, %arg5: memref<6x32xf32, #tpu.memory_space<vmem>>, %arg6: memref<32x12xf32, #tpu.memory_space<vmem>>, %arg7: memref<2x32xf32, #tpu.memory_space<vmem>>, %arg8: memref<2x7x32xf32, #tpu.memory_space<vmem>>) attributes {dimension_semantics = [#tpu.dimension_semantics<parallel>, #tpu.dimension_semantics<arbitrary>], iteration_bounds = array<i64: 1, 1>, scalar_prefetch = 0 : i64, scratch_operands = 1 : i64, tpu.core_type = #tpu.core_type<tc>, window_params = [{transform_indices = @transform_0, window_bounds = array<i64: 2, 8, 32>}, {pipeline_mode = #tpu.pipeline_mode<synchronous>, transform_indices = @transform_1, window_bounds = array<i64: 32, 6>}, {pipeline_mode = #tpu.pipeline_mode<synchronous>, transform_indices = @transform_2, window_bounds = array<i64: 6, 32>}, {pipeline_mode = #tpu.pipeline_mode<synchronous>, transform_indices = @transform_3, window_bounds = array<i64: 6, 32>}, {pipeline_mode = #tpu.pipeline_mode<synchronous>, transform_indices = @transform_4, window_bounds = array<i64: 32, 12>}, {transform_indices = @transform_5, window_bounds = array<i64: 2, 32>}]} {
    %c0_i32 = arith.constant 0 : i32
    %0 = arith.cmpi eq, %arg1, %c0_i32 : i32
    %1 = arith.extui %0 : i1 to i32
    %c0_i32_0 = arith.constant 0 : i32
    %2 = arith.cmpi ne, %1, %c0_i32_0 : i32
    scf.if %2 {
      %cst_23 = arith.constant 0.000000e+00 : f32
      %40 = vector.broadcast %cst_23 : f32 to vector<2x7x32xf32>
      %c0_24 = arith.constant 0 : index
      %c0_25 = arith.constant 0 : index
      %c0_26 = arith.constant 0 : index
      %41 = vector.load %arg8[%c0_24, %c0_25, %c0_26] : memref<2x7x32xf32, #tpu.memory_space<vmem>>, vector<2x7x32xf32>
      tpu.vector_store %arg8[%c0_24, %c0_25, %c0_26], %40 {strides = array<i32>} : memref<2x7x32xf32, #tpu.memory_space<vmem>>, vector<2x7x32xf32>,
    } else {
    }
    %c0 = arith.constant 0 : index
    %c0_1 = arith.constant 0 : index
    %c0_2 = arith.constant 0 : index
    %3 = vector.load %arg2[%c0, %c0_1, %c0_2] : memref<2x8x32xf32, #tpu.memory_space<vmem>>, vector<2x8x32xf32>
    %c0_3 = arith.constant 0 : index
    %c0_4 = arith.constant 0 : index
    %4 = vector.load %arg6[%c0_3, %c0_4] : memref<32x12xf32, #tpu.memory_space<vmem>>, vector<32x12xf32>
    %5 = vector.shape_cast %3 : vector<2x8x32xf32> to vector<16x32xf32>
    %cst = arith.constant dense<0.000000e+00> : vector<16x12xf32>
    %6 = tpu.matmul %5, %4, %cst {dimension_numbers = #tpu.dot_dimension_numbers<[1], [0], [0], [1], [0, 0, 1, 1], [], []>} : vector<16x32xf32>, vector<32x12xf32>, vector<16x12xf32> -> vector<16x12xf32>
    %7 = vector.extract_strided_slice %6 {offsets = [0, 0], sizes = [16, 6], strides = [1, 1]} : vector<16x12xf32> to vector<16x6xf32>
    %8 = vector.extract_strided_slice %6 {offsets = [0, 6], sizes = [16, 6], strides = [1, 1]} : vector<16x12xf32> to vector<16x6xf32>
    %9 = arith.mulf %7, %8 : vector<16x6xf32>
    %cst_5 = arith.constant dense<0.000000e+00> : vector<16xf32>
    %10 = vector.multi_reduction <add>, %9, %cst_5 [1] : vector<16x6xf32> to vector<16xf32>
    %11 = vector.shape_cast %10 : vector<16xf32> to vector<16x1xf32>
    %cst_6 = arith.constant 1.000000e-24 : f32
    %12 = vector.broadcast %cst_6 : f32 to vector<16x1xf32>
    %13 = arith.maximumf %11, %12 : vector<16x1xf32>
    %14 = math.rsqrt %13 : vector<16x1xf32>
    %cst_7 = arith.constant 1.000000e+00 : f32
    %15 = vector.broadcast %cst_7 : f32 to vector<16x1xf32>
    %16 = vector.broadcast %14 : vector<16x1xf32> to vector<16x6xf32>
    %17 = arith.mulf %7, %16 : vector<16x6xf32>
    %18 = tpu.concatenate %15, %17 in 1 : vector<16x1xf32>, vector<16x6xf32> -> vector<16x7xf32>
    %c0_8 = arith.constant 0 : index
    %c0_9 = arith.constant 0 : index
    %c0_10 = arith.constant 0 : index
    %19 = vector.load %arg8[%c0_8, %c0_9, %c0_10] : memref<2x7x32xf32, #tpu.memory_space<vmem>>, vector<1x7x32xf32>
    %20 = vector.shape_cast %19 : vector<1x7x32xf32> to vector<7x32xf32>
    %21 = vector.extract_strided_slice %18 {offsets = [0, 0], sizes = [8, 7], strides = [1, 1]} : vector<16x7xf32> to vector<8x7xf32>
    %22 = vector.extract_strided_slice %5 {offsets = [0, 0], sizes = [8, 32], strides = [1, 1]} : vector<16x32xf32> to vector<8x32xf32>
    %cst_11 = arith.constant dense<0.000000e+00> : vector<7x32xf32>
    %23 = tpu.matmul %21, %22, %cst_11 {dimension_numbers = #tpu.dot_dimension_numbers<[0], [0], [1], [1], [0, 1, 1, 1], [], []>} : vector<8x7xf32>, vector<8x32xf32>, vector<7x32xf32> -> vector<7x32xf32>
    %24 = arith.addf %20, %23 : vector<7x32xf32>
    %c0_12 = arith.constant 0 : index
    %c0_13 = arith.constant 0 : index
    %c0_14 = arith.constant 0 : index
    %25 = vector.load %arg8[%c0_12, %c0_13, %c0_14] : memref<2x7x32xf32, #tpu.memory_space<vmem>>, vector<1x7x32xf32>
    %26 = vector.shape_cast %25 : vector<1x7x32xf32> to vector<7x32xf32>
    %27 = vector.shape_cast %24 : vector<7x32xf32> to vector<1x7x32xf32>
    tpu.vector_store %arg8[%c0_12, %c0_13, %c0_14], %27 {strides = array<i32>} : memref<2x7x32xf32, #tpu.memory_space<vmem>>, vector<1x7x32xf32>,
    %c1 = arith.constant 1 : index
    %c0_15 = arith.constant 0 : index
    %c0_16 = arith.constant 0 : index
    %28 = vector.load %arg8[%c1, %c0_15, %c0_16] : memref<2x7x32xf32, #tpu.memory_space<vmem>>, vector<1x7x32xf32>
    %29 = vector.shape_cast %28 : vector<1x7x32xf32> to vector<7x32xf32>
    %30 = vector.extract_strided_slice %18 {offsets = [8, 0], sizes = [8, 7], strides = [1, 1]} : vector<16x7xf32> to vector<8x7xf32>
    %31 = vector.extract_strided_slice %5 {offsets = [8, 0], sizes = [8, 32], strides = [1, 1]} : vector<16x32xf32> to vector<8x32xf32>
    %cst_17 = arith.constant dense<0.000000e+00> : vector<7x32xf32>
    %32 = tpu.matmul %30, %31, %cst_17 {dimension_numbers = #tpu.dot_dimension_numbers<[0], [0], [1], [1], [0, 1, 1, 1], [], []>} : vector<8x7xf32>, vector<8x32xf32>, vector<7x32xf32> -> vector<7x32xf32>
    %33 = arith.addf %29, %32 : vector<7x32xf32>
    %c1_18 = arith.constant 1 : index
    %c0_19 = arith.constant 0 : index
    %c0_20 = arith.constant 0 : index
    %34 = vector.load %arg8[%c1_18, %c0_19, %c0_20] : memref<2x7x32xf32, #tpu.memory_space<vmem>>, vector<1x7x32xf32>
    %35 = vector.shape_cast %34 : vector<1x7x32xf32> to vector<7x32xf32>
    %36 = vector.shape_cast %33 : vector<7x32xf32> to vector<1x7x32xf32>
    tpu.vector_store %arg8[%c1_18, %c0_19, %c0_20], %36 {strides = array<i32>} : memref<2x7x32xf32, #tpu.memory_space<vmem>>, vector<1x7x32xf32>,
    %c0_i32_21 = arith.constant 0 : i32
    %37 = arith.cmpi eq, %arg1, %c0_i32_21 : i32
    %38 = arith.extui %37 : i1 to i32
    %c0_i32_22 = arith.constant 0 : i32
    %39 = arith.cmpi ne, %38, %c0_i32_22 : i32
    scf.if %39 {
      %c0_23 = arith.constant 0 : index
      %c0_24 = arith.constant 0 : index
      %40 = vector.load %arg3[%c0_23, %c0_24] : memref<32x6xf32, #tpu.memory_space<vmem>>, vector<32x6xf32>
      %c0_25 = arith.constant 0 : index
      %c0_26 = arith.constant 0 : index
      %41 = vector.load %arg4[%c0_25, %c0_26] : memref<6x32xf32, #tpu.memory_space<vmem>>, vector<6x32xf32>
      %c0_27 = arith.constant 0 : index
      %c0_28 = arith.constant 0 : index
      %42 = vector.load %arg5[%c0_27, %c0_28] : memref<6x32xf32, #tpu.memory_space<vmem>>, vector<6x32xf32>
      %c0_29 = arith.constant 0 : index
      %c0_30 = arith.constant 0 : index
      %c0_31 = arith.constant 0 : index
      %43 = vector.load %arg8[%c0_29, %c0_30, %c0_31] : memref<2x7x32xf32, #tpu.memory_space<vmem>>, vector<2x7x32xf32>
      %44 = vector.extract_strided_slice %43 {offsets = [0, 0, 0], sizes = [2, 1, 32], strides = [1, 1, 1]} : vector<2x7x32xf32> to vector<2x1x32xf32>
      %45 = vector.shape_cast %44 : vector<2x1x32xf32> to vector<2x32xf32>
      %46 = vector.extract_strided_slice %43 {offsets = [0, 1, 0], sizes = [2, 6, 32], strides = [1, 1, 1]} : vector<2x7x32xf32> to vector<2x6x32xf32>
      %cst_32 = arith.constant dense<0.000000e+00> : vector<2x6xf32>
      %47 = tpu.matmul %45, %40, %cst_32 {dimension_numbers = #tpu.dot_dimension_numbers<[1], [0], [0], [1], [0, 0, 1, 1], [], []>} : vector<2x32xf32>, vector<32x6xf32>, vector<2x6xf32> -> vector<2x6xf32>
      %cst_33 = arith.constant dense<0.000000e+00> : vector<2x32xf32>
      %48 = tpu.matmul %47, %41, %cst_33 {dimension_numbers = #tpu.dot_dimension_numbers<[1], [0], [0], [1], [0, 0, 1, 1], [], []>} : vector<2x6xf32>, vector<6x32xf32>, vector<2x32xf32> -> vector<2x32xf32>
      "tpu.trace_start"() <{level = 10 : i32, message = "bh,rh->br"}> : () -> ()
      %cst_34 = arith.constant dense<0.000000e+00> : vector<2x6xf32>
      %49 = tpu.matmul %48, %42, %cst_34 {dimension_numbers = #tpu.dot_dimension_numbers<[1], [1], [0], [0], [0, 0, 1, 0], [], []>} : vector<2x32xf32>, vector<6x32xf32>, vector<2x6xf32> -> vector<2x6xf32>
      "tpu.trace_stop"() : () -> ()
      %50 = arith.mulf %48, %48 : vector<2x32xf32>
      %cst_35 = arith.constant dense<0.000000e+00> : vector<2xf32>
      %51 = vector.multi_reduction <add>, %50, %cst_35 [1] : vector<2x32xf32> to vector<2xf32>
      %52 = vector.shape_cast %51 : vector<2xf32> to vector<2x1xf32>
      %cst_36 = arith.constant 1.000000e-24 : f32
      %53 = vector.broadcast %cst_36 : f32 to vector<2x1xf32>
      %54 = arith.maximumf %52, %53 : vector<2x1xf32>
      %55 = math.rsqrt %54 : vector<2x1xf32>
      %56 = vector.shape_cast %49 : vector<2x6xf32> to vector<2x6x1xf32>
      %57 = vector.broadcast %56 : vector<2x6x1xf32> to vector<2x6x32xf32>
      %58 = arith.mulf %46, %57 : vector<2x6x32xf32>
      %cst_37 = arith.constant dense<0.000000e+00> : vector<2x32xf32>
      %59 = vector.multi_reduction <add>, %58, %cst_37 [1] : vector<2x6x32xf32> to vector<2x32xf32>
      %60 = vector.broadcast %55 : vector<2x1xf32> to vector<2x32xf32>
      %61 = arith.mulf %59, %60 : vector<2x32xf32>
      %c0_38 = arith.constant 0 : index
      %c0_39 = arith.constant 0 : index
      %62 = vector.load %arg7[%c0_38, %c0_39] : memref<2x32xf32, #tpu.memory_space<vmem>>, vector<2x32xf32>
      tpu.vector_store %arg7[%c0_38, %c0_39], %61 {strides = array<i32>} : memref<2x32xf32, #tpu.memory_space<vmem>>, vector<2x32xf32>,
    } else {
    }
    return
  }
  func.func @transform_0(%arg0: i32, %arg1: i32) -> (i32, i32, i32) {
    %c0_i32 = arith.constant 0 : i32
    %c0_i32_0 = arith.constant 0 : i32
    return %arg0, %arg1, %c0_i32 : i32, i32, i32
  }
  func.func @transform_1(%arg0: i32, %arg1: i32) -> (i32, i32) {
    %c0_i32 = arith.constant 0 : i32
    %c0_i32_0 = arith.constant 0 : i32
    %c0_i32_1 = arith.constant 0 : i32
    return %c0_i32, %c0_i32_0 : i32, i32
  }
  func.func @transform_2(%arg0: i32, %arg1: i32) -> (i32, i32) {
    %c0_i32 = arith.constant 0 : i32
    %c0_i32_0 = arith.constant 0 : i32
    %c0_i32_1 = arith.constant 0 : i32
    return %c0_i32, %c0_i32_0 : i32, i32
  }
  func.func @transform_3(%arg0: i32, %arg1: i32) -> (i32, i32) {
    %c0_i32 = arith.constant 0 : i32
    %c0_i32_0 = arith.constant 0 : i32
    %c0_i32_1 = arith.constant 0 : i32
    return %c0_i32, %c0_i32_0 : i32, i32
  }
  func.func @transform_4(%arg0: i32, %arg1: i32) -> (i32, i32) {
    %c0_i32 = arith.constant 0 : i32
    %c0_i32_0 = arith.constant 0 : i32
    %c0_i32_1 = arith.constant 0 : i32
    return %c0_i32, %c0_i32_0 : i32, i32
  }
  func.func @transform_5(%arg0: i32, %arg1: i32) -> (i32, i32) {
    %c0_i32 = arith.constant 0 : i32
    %c0_i32_0 = arith.constant 0 : i32
    return %arg0, %c0_i32 : i32, i32
  }
}

</mosaic_0001>

<bundles_post_ra>
// kernel: tpu_custom_call.1
= control target key start
LH: loop header
LB: loop body
LE: loop exit
PB: predicated region body
PF: predicated region fallthrough
CT: control target
= control target key end

     0   :  { %vm34_vm0 = vcmask 261120   ;;  %s922_s0 = inlined_call_operand.vmem [shape: f32[2,8,32], index: 0, kind: input, shape index: {}]   ;;  %s923_s1 = inlined_call_operand.vmem [shape: f32[32,6], index: 1, kind: input, shape index: {}]   ;;  %s924_s2 = inlined_call_operand.vmem [shape: f32[6,32], index: 2, kind: input, shape index: {}]   ;;  %s925_s3 = inlined_call_operand.vmem [shape: f32[6,32], index: 3, kind: input, shape index: {}]   ;;  %s926_s4 = inlined_call_operand.vmem [shape: f32[32,12], index: 4, kind: input, shape index: {}]   ;;  %s927_s5 = inlined_call_operand.hbm [shape: f32[2,32], index: 5, kind: output, shape index: {}]  }
   0x1   :  { %v30_v0 = vld [vmem:[%s926_s4] sm:$0xff]  ;;  %v31_v1 = vld [vmem:[%s926_s4 + $0x8] sm:$0xff]  ;;  %v32_v2 = vld [vmem:[%s926_s4 + $0x10] sm:$0xff] }
   0x2   :  { %v756_v3 = vpack.c.bf16 %v31_v1, %v30_v0  ;;  %v33_v4 = vld [vmem:[%s926_s4 + $0x18] sm:$0xff]  ;;  %v28_v5 = vld [vmem:[%s922_s0] sm:$0xff] }
   0x3   :  { %v760_v6 = vpack.c.bf16 %v33_v4, %v32_v2  ;;  %722 = vmatprep.mubr.msk.f32.mxu0 %vm34_vm0, %v28_v5 }
   0x4   :  { %10 = vsyncpa [#allocation4], 0  ;;  %757 = vmatprep.subr.bf16.mxu0 %v756_v3  ;;  %v29_v7 = vld [vmem:[%s922_s0 + $0x8] sm:$0xff]  ;;  %s806_s4 = smov 122   ;;  %vm126_vm1 = vcmask 48128   ;;  %v807_v20 = vmov 0.0   ;;  %v617_v58 = vlaneseq }
   0x5   :  { %759 = vmatpush3.bf16.msra.mxu0 %v756_v3  ;;  %725 = vmatprep.subr.mxu1 %v807_v20  ;;  %s808_s0 = smov 1   ;;  %vm147_vm2 = vcmask 7168   ;;  %vm809_vm3 = vmmov 0   ;;  %vm25_vm4 = vcmask 260096   ;;  %vm183_vm5 = vcmask 64512   ;;  %v372_v31 = vld [vmem:[%s923_s1] sm:$0xff] }
   0x6   :  { %761 = vmatprep.subr.bf16.mxu0 %v760_v6  ;;  %726 = vmatpush3.msra.mxu1 %v28_v5  ;;  %26 = vst.msk [vmem:[#allocation2] sm:$0x7f] %vm25_vm4, %v807_v20  ;;  %27 = vst.msk [vmem:[#allocation2 + $0x8] sm:$0x7f] %vm25_vm4, %v807_v20  ;;  %v373_v32 = vld [vmem:[%s923_s1 + $0x8] sm:$0xff]  ;;  %v374_v33 = vld [vmem:[%s923_s1 + $0x10] sm:$0xff] }
   0x7   :  { %730 = vmatprep.subr.mxu1 %v807_v20  ;;  %727 = vmatprep.mubr.msk.f32.mxu1 %vm809_vm3, %v807_v20  ;;  %v810_v34 = vmov 0.0|0.0   ;;  %v765_v35 = vpack.c.bf16 %v373_v32, %v372_v31  ;;  %v375_v36 = vld [vmem:[%s923_s1 + $0x18] sm:$0xff]  ;;  %v376_v38 = vld [vmem:[%s924_s2] sm:$0x3f]  ;;  %vm460_vm6 = vcmask 1045504   ;;  %vm383_vm7 = vcmask 1041409  }
   0x8   :  { %v768_v37 = vpack.c.bf16 %v375_v36, %v374_v33  ;;  %v377_v51 = vld [vmem:[%s925_s3] sm:$0x3f]  ;;  %vm611_vm8 = vcmask 254976   ;;  %v618_v59 = vshrl.u32 %v617_v58, 7  ;;  %vm645_vm9 = vcmask 259072   ;;  %s811_s3 = smov [#allocation3]  }
   0x9   :  { %763 = vmatpush3.bf16.msra.mxu0 %v760_v6  ;;  %s678_s15 = sshll.u32 %s811_s3, 4  ;;  %s679_s15 = int_to_ptr.vmem [resolvable:$true] %s678_s15 }
   0xa   :  { %746 = vmatprep.subr.mxu0 %v807_v20  ;;  %v626_v60 = vsub.s32 1, %v618_v59  ;;  %v619_v61 = vsub.s32 0, %v618_v59  ;;  %s782_s16 = scalar_lea.vmem %s679_s15, 32  ;;  %p787_p1 = scmp.lt.s32.totalorder %s679_s15, %s679_s15 }
   0xb   :  { %p783_p0 = scmp.ne.s32.totalorder %s679_s15, %s782_s16  ;;  %p788_p2 = scmp.lt.s32.totalorder %s782_s16, %s782_s16 }
   0xc   :  { %723 = vmatmul.mubr.msk.f32.vlgmr.msra.gmra.mrb[0].mxu0 %vm34_vm0, %v29_v7 }
   0xd   :  { %748 = vmatprep.mubr.msk.f32.mxu0 %vm809_vm3, %v807_v20  ;;  %747 = vmatpush3.msk.msra.mxu0 %vm460_vm6, %v376_v38  ;;  %v150_v39 = vld [vmem:[#allocation2] sm:$0x7f]  ;;  %v261_v43 = vld [vmem:[#allocation2 + $0x8] sm:$0x7f]  ;;  %p789_p3 = por %p788_p2, %p787_p1 }
   0xe   :  { %751 = vmatprep.subr.mxu0 %v807_v20 }
   0xf   :  { %p790_p4 = pnand %p789_p3, %p783_p0 }
  0xdf   :  { %v724_v8 = vpop.f32.mrb[0].mxu0 }
  0xe0   :  { %v107_v9 = vpop.f32.mrb[1].mxu0 }
  0xe1   :  { %118 = vrot.lane.b32.xlu0 %v107_v9, %s806_s4 }
  0xe5   :  { %120 = vrot.lane.b32.xlu0 %v724_v8, %s806_s4 }
 0x153   :  { %v119_v10 = vpop.permute.xlu0 %118 }
 0x154   :  { %v124_v11 = vmul.f32 %v119_v10, %v107_v9 }
 0x156   :  { %v127_v12 = vsel %vm126_vm1, %v124_v11, 0.0 }
 0x157   :  { %128 = vadd.xlane.f32.xlu1 %v127_v12  ;;  %v121_v13 = vpop.permute.xlu0 %120 }
 0x158   :  { %v125_v14 = vmul.f32 %v724_v8, %v121_v13 }
 0x15a   :  { %v130_v15 = vsel %vm126_vm1, %v125_v14, 0.0 }
 0x15b   :  { %131 = vadd.xlane.f32.xlu1 %v130_v15 }
 0x1e4   :  { %v129_v16 = vpop.xlane.xlu1 %128 }
 0x1e5   :  { %v133_v17 = vmax.f32 %v129_v16, 1e-24 }
 0x1e7   :  { %776 = vrsqrt.f32 %v133_v17 }
 0x1e8   :  { %v132_v18 = vpop.xlane.xlu1 %131 }
 0x1e9   :  { %v134_v19 = vmax.f32 %v132_v18, 1e-24 }
 0x1eb   :  { %778 = vrsqrt.f32 %v134_v19 }
 0x1f1   :  { %v777_v21 = vpop.eup %776 }
 0x1f2   :  { %v137_v22 = vmul.f32 %v777_v21, %v107_v9 }
 0x1f4   :  { %141 = vrot.lane.b32.xlu0 %v137_v22, %s808_s0 }
 0x1f5   :  { %v779_v23 = vpop.eup %778 }
 0x1f6   :  { %v138_v24 = vmul.f32 %v779_v23, %v724_v8 }
 0x1f8   :  { %143 = vrot.lane.b32.xlu1 %v138_v24, %s808_s0 }
 0x266   :  { %v142_v25 = vpop.permute.xlu0 %141 }
 0x267   :  { %v148_v26 = vsel %vm147_vm2, 1.0, %v142_v25 }
 0x268   :  { %151 = vxpose.xlu0.b32.start.end [1/1] (short) (narrow) %v148_v26, 8 }
 0x26a   :  { %v144_v27 = vpop.permute.xlu1 %143 }
 0x26b   :  { %v149_v28 = vsel %vm147_vm2, 1.0, %v144_v27 }
 0x26c   :  { %262 = vxpose.xlu1.b32.start.end [1/1] (short) (narrow) %v149_v28, 8 }
 0x2e8   :  { %v167_v29 = vpop.trf.xlu0 }
 0x2e9   :  { %728 = vmatmul.mubr.msk.f32.vlgmr.msra.gmra.mrb[0].mxu1 %vm183_vm5, %v167_v29 }
 0x2ea   :  { %731 = vmatpush3.msra.mxu1 %v29_v7  ;;  %732 = vmatprep.mubr.msk.f32.mxu1 %vm809_vm3, %v807_v20 }
 0x2eb   :  { %764 = vmatprep.subr.bf16.mxu1 %v810_v34 }
 0x2ec   :  { %v278_v30 = vpop.trf.xlu1 }
 0x2ed   :  { %733 = vmatmul.mubr.msk.f32.vlgmr.msra.gmra.mrb[2].mxu1 %vm183_vm5, %v278_v30 }
 0x2ee   :  { %743 = vmatprep.mubr.msk.f32.mxu1 %vm809_vm3, %v807_v20  ;;  %766 = vmatpush3.bf16.msra.mxu1 %v765_v35 }
 0x2ef   :  { %767 = vmatprep.subr.bf16.mxu1 %v810_v34 }
 0x2f2   :  { %769 = vmatpush3.bf16.msra.mxu1 %v768_v37 }
 0x3bc   :  { %v253_v40 = vpop.f32.mrb[0].mxu1 }
 0x3bd   :  { %v257_v41 = vadd.f32 %v253_v40, %v150_v39  ;;  %v729_v42 = vpop.f32.mrb[1].mxu1 }
 0x3bf   :  { %259 = vst.msk [vmem:[#allocation2] sm:$0x7f] %vm25_vm4, %v257_v41 }
 0x3c0   :  { %v363_v44 = vpop.f32.mrb[2].mxu1 }
 0x3c1   :  { %v367_v45 = vadd.f32 %v363_v44, %v261_v43  ;;  %v734_v46 = vpop.f32.mrb[3].mxu1 }
 0x3c3   :  { %368 = vst.msk [vmem:[#allocation2 + $0x8] sm:$0x7f] %vm25_vm4, %v367_v45 }
 0x3c6   :  { %v378_v49 = vld [vmem:[#allocation2] sm:$0x7f] }
 0x3ca   :  { %v379_v47 = vld [vmem:[#allocation2 + $0x8] sm:$0x7f] }
 0x3cb   :  { %v382_v48 = vrot.slane %v379_v47, 7 }
 0x3cd   :  { %v384_v50 = vsel %vm383_vm7, %v382_v48, %v378_v49 }
 0x3ce   :  { %744 = vmatmul.mubr.msk.f32.vlgmr.msra.gmra.mrb[4].mxu1 %vm34_vm0, %v384_v50 }
 0x4a1   :  { %v453_v52 = vpop.f32.mrb[4].mxu1 }
 0x4a2   :  { %v745_v53 = vpop.f32.mrb[5].mxu1  ;;  %749 = vmatmul.mubr.msk.f32.vlgmr.msra.gmra.mrb[2].mxu0 %vm126_vm1, %v453_v52 }
 0x4a3   :  { %752 = vmatpush3.xpose.msk.msra.mxu0 %vm34_vm0, %v377_v51  ;;  %753 = vmatprep.mubr.msk.f32.mxu0 %vm809_vm3, %v807_v20 }
 0x575   :  { %v530_v54 = vpop.f32.mrb[2].mxu0 }
 0x576   :  { %v610_v55 = vmul.f32 %v530_v54, %v530_v54  ;;  %v750_v56 = vpop.f32.mrb[3].mxu0  ;;  %754 = vmatmul.mubr.msk.f32.vlgmr.msra.gmra.mrb[4].mxu0 %vm34_vm0, %v530_v54 }
 0x578   :  { %v612_v57 = vsel %vm611_vm8, %v610_v55, 0.0 }
 0x579   :  { %613 = vadd.xlane.f32.xlu0 %v612_v57 }
 0x606   :  { %v614_v2 = vpop.xlane.xlu0 %613 }
 0x607   :  { %v615_v5 = vmax.f32 %v614_v2, 1e-24 }
 0x609   :  { %780 = vrsqrt.f32 %v615_v5 }
 0x613   :  { %v781_v22 = vpop.eup %780 }
 0x614   :  { %v661_v27 = vrot.slane %v781_v22, 1 }
 0x649   :  { %v606_v62 = vpop.f32.mrb[4].mxu0 }
 0x64a   :  { %v755_v63 = vpop.f32.mrb[5].mxu0  ;;  %v627_v0 = vrot.slane %v606_v62, %v626_v60  ;;  %v620_v1 = vrot.slane %v606_v62, %v619_v61 }
 0x64c   :  { %629 = vbcast.lane.b32.xlu1 %v627_v0, 256  ;;  %622 = vbcast.lane.b32.xlu0 %v620_v1, 256 }
 0x6be   :  { %v630_v3 = vpop.permute.xlu1 %629  ;;  %v623_v4 = vpop.permute.xlu0 %622 }
 0x6bf   :  { %v634_v6 = vrot.slane %v630_v3, 7  ;;  %v633_v7 = vrot.slane %v623_v4, 7 }
 0x6c1   :  { %v638_v8 = vmul.f32 %v634_v6, %v379_v47  ;;  %v637_v9 = vmul.f32 %v633_v7, %v378_v49 }
 0x6c3   :  { %v642_v10 = vrot.slane %v638_v8, 1  ;;  %v641_v11 = vrot.slane %v637_v9, 1 }
 0x6c5   :  { %v653_v12 = vsel %vm645_vm9, %v642_v10, 0.0  ;;  %v646_v13 = vsel %vm645_vm9, %v641_v11, 0.0 }
 0x6c6   :  { %v654_v14 = vrot.slane %v653_v12, 4  ;;  %v647_v15 = vrot.slane %v646_v13, 4 }
 0x6c8   :  { %v655_v16 = vadd.f32 %v654_v14, %v653_v12  ;;  %v648_v17 = vadd.f32 %v647_v15, %v646_v13 }
 0x6ca   :  { %v656_v18 = vrot.slane %v655_v16, 2  ;;  %v649_v19 = vrot.slane %v648_v17, 2 }
 0x6cc   :  { %v657_v20 = vadd.f32 %v656_v18, %v655_v16  ;;  %v650_v21 = vadd.f32 %v649_v19, %v648_v17 }
 0x6ce   :  { %v658_v23 = vrot.slane %v657_v20, 1  ;;  %v651_v24 = vrot.slane %v650_v21, 1 }
 0x6d0   :  { %v659_v25 = vadd.f32 %v658_v23, %v657_v20  ;;  %v652_v26 = vadd.f32 %v651_v24, %v650_v21 }
 0x6d2   :  { %v665_v28 = vmul.f32 %v661_v27, %v659_v25  ;;  %v664_v29 = vmul.f32 %v781_v22, %v652_v26 }
 0x6d4   :  { %v668_v30 = vrot.slane %v665_v28, 7 }
 0x6d6   :  { %v669_v31 = vsel %vm383_vm7, %v668_v30, %v664_v29 }
 0x6d7   :  { %671 = vst.msk [vmem:[#allocation3] sm:$0x3] %vm611_vm8, %v669_v31 }
 0x6d8   :  { %793 = shalt.err (!%p790_p4)
}
 0x6d9   :  { %s794_s19 = scalar_lea.hbm %s927_s5, 32 }
 0x6da   :  { %p795_p5 = scmp.ne.s32.totalorder %s927_s5, %s794_s19  ;;  %p798_p6 = scmp.lt.u32.totalorder %s794_s19, %s927_s5 }
 0x6dc   :  { %p800_p7 = pnand %p798_p6, %p795_p5 }
 0x6de   :  { %803 = shalt.err (!%p800_p7)
}
 0x6df   :  { %681 = dma.vmem_to_hbm [thread:$0]  %s679_s15, 32, %s927_s5, [#allocation4]  }
 0x6e0   :  { %804 = dma.done.wait [#allocation4], 32  }
 0x6e1   :  { %805 = vsyncadd [#allocation4], 4294967264 }
 0x6e2   :  { %685 = vsyncpa [#allocation4], 1 }

</bundles_post_ra>
